<compile_context>
chip_gen: v6e
topology: v6e:2x2x1
jax: 0.10.0
libtpu: 0.0.40
codegen_flags: <defaults>
</compile_context>

<pallas_src>
import functools

import jax
import jax.numpy as jnp
from jax.experimental import pallas as pl
from jax.experimental.pallas import tpu as pltpu


def _round_up(a, b):
    return (a + b - 1) // b * b


def _causal_conv_kernel(xp_ref, xc_ref, w_ref, b_ref, o_ref, *, kernel_size):
    # xp_ref: (ov, C_in)      last `ov` rows of the previous tile (left context)
    # xc_ref: (tile_l, C_in)  current tile
    # w_ref : (K, C_in, C_out)
    # b_ref : (1, C_out)
    # o_ref : (tile_l, C_out)
    j = pl.program_id(1)

    ov = xp_ref.shape[0]
    tile_l = xc_ref.shape[0]
    c_out = o_ref.shape[-1]

    x_prev = xp_ref[...].astype(jnp.float32)
    # At the start of the sequence the left context is the causal zero padding.
    x_prev = jnp.where(j > 0, x_prev, jnp.zeros_like(x_prev))
    x_cur = xc_ref[...].astype(jnp.float32)
    # Rows [j*tile_l - ov, (j+1)*tile_l) of the (virtually left-padded) sequence.
    x_win = jnp.concatenate([x_prev, x_cur], axis=0)      # (ov + tile_l, C_in)

    base = ov - (kernel_size - 1)
    acc = jnp.zeros((tile_l, c_out), jnp.float32)
    for k in range(kernel_size):                          # static unroll, K is small
        acc = acc + jnp.dot(
            x_win[base + k: base + k + tile_l, :],
            w_ref[k].astype(jnp.float32),
            preferred_element_type=jnp.float32,
        )
    acc = acc + b_ref[...].astype(jnp.float32)            # (1, C_out) broadcast
    o_ref[...] = acc.astype(o_ref.dtype)


def causal_conv1d(x, weight, bias, *, stride=1, block_len=256,
                  vmem_limit_bytes=48 * 1024 * 1024):
    """Causal Conv1d matching the PyTorch module.

    x:      (B, C_in, L)        (torch Conv1d layout)
    weight: (C_out, C_in, K)
    bias:   (C_out,)
    returns (B, C_out, L)
    """
    if stride != 1:
        # TODO(synk): strided causal conv (module default is stride=1).
        raise NotImplementedError("stride > 1 not implemented")

    B, C_in, L = x.shape
    C_out, C_in_w, K = weight.shape
    assert C_in_w == C_in and bias.shape == (C_out,)

    # Channels-last so the channel axis is the lane axis.
    x_cl = jnp.transpose(x, (0, 2, 1))        # (B, L, C_in)
    w_k = jnp.transpose(weight, (2, 1, 0))    # (K, C_in, C_out)
    b2d = bias.reshape(1, C_out)

    # Row tile along L (multiple of 8, or the full length for short sequences).
    block_len = _round_up(max(block_len, 8), 8)
    tile_l = L if L <= block_len else block_len
    if K - 1 > tile_l:
        # TODO(synk): kernel_size larger than the L tile (needs multi-tile left context).
        raise NotImplementedError("kernel_size - 1 must be <= L tile length")
    num_l_tiles = pl.cdiv(L, tile_l)

    # Overlap window = left context rows, sublane aligned and dividing tile_l.
    ov = _round_up(max(K - 1, 1), 8)
    if ov > tile_l or tile_l % ov != 0:
        ov = tile_l
    bpt = tile_l // ov   # overlap-blocks per L-tile

    grid = (B, num_l_tiles)

    out_cl = pl.pallas_call(
        functools.partial(_causal_conv_kernel, kernel_size=K),
        out_shape=jax.ShapeDtypeStruct((B, L, C_out), x.dtype),
        grid_spec=pltpu.PrefetchScalarGridSpec(
            num_scalar_prefetch=0,
            grid=grid,
            in_specs=[
                # Left-context block: the ov rows just before this tile.
                pl.BlockSpec((None, ov, C_in),
                             lambda b, j: (b, jnp.maximum(j * bpt - 1, 0), 0)),
                # Current tile.
                pl.BlockSpec((None, tile_l, C_in), lambda b, j: (b, j, 0)),
                # Full weight and bias, resident across the grid.
                # TODO(synk): tile C_out/C_in for very large channel counts where the
                # full (K, C_in, C_out) weight does not fit VMEM.
                pl.BlockSpec((K, C_in, C_out), lambda b, j: (0, 0, 0)),
                pl.BlockSpec((1, C_out), lambda b, j: (0, 0)),
            ],
            out_specs=pl.BlockSpec((None, tile_l, C_out), lambda b, j: (b, j, 0)),
        ),
        compiler_params=pltpu.CompilerParams(
            dimension_semantics=("parallel", "parallel"),
            vmem_limit_bytes=vmem_limit_bytes,
        ),
    )(x_cl, x_cl, w_k, b2d)

    return jnp.transpose(out_cl, (0, 2, 1))   # (B, C_out, L)


def causal_conv_reference(x, weight, bias, stride=1):
    """Pure-JAX reference matching the PyTorch module's forward."""
    K = weight.shape[-1]
    x_pad = jnp.pad(x.astype(jnp.float32), ((0, 0), (0, 0), (K - 1, 0)))
    out = jax.lax.conv_general_dilated(
        x_pad, weight.astype(jnp.float32),
        window_strides=(stride,), padding="VALID",
        dimension_numbers=("NCH", "OIH", "NCH"))
    return (out + bias.astype(jnp.float32)[None, :, None]).astype(x.dtype)


if __name__ == "__main__":
    key = jax.random.PRNGKey(0)
    k_x, k_w, k_b = jax.random.split(key, 3)

    batch, dim_in, dim_out, seq, kernel_size = 2, 4, 8, 16, 4

    # Make test operands exactly bf16-representable so the check is insensitive
    # to the MXU's f32 pass count.
    x = jax.random.normal(k_x, (batch, dim_in, seq), dtype=jnp.float32)
    x = x.astype(jnp.bfloat16).astype(jnp.float32)
    fan_in = dim_in * kernel_size
    weight = (jax.random.normal(k_w, (dim_out, dim_in, kernel_size),
                                dtype=jnp.float32) / (fan_in ** 0.5))
    weight = weight.astype(jnp.bfloat16).astype(jnp.float32)
    bias = (jax.random.normal(k_b, (dim_out,), dtype=jnp.float32) * 0.1)
    bias = bias.astype(jnp.bfloat16).astype(jnp.float32)

    out = causal_conv1d(x, weight, bias)
    out = jax.block_until_ready(out)

    ref = causal_conv_reference(x, weight, bias)
    assert out.shape == (batch, dim_out, seq)
    assert jnp.allclose(out, ref, atol=1e-4, rtol=1e-4), "mismatch vs reference"

    print("KERNEL_OK")
</pallas_src>

<mosaic_0001>
module attributes {stable_mosaic.version = 11 : i64} {
  func.func @_causal_conv_kernel(%arg0: i32, %arg1: i32, %arg2: memref<1x8x4xf32, #tpu.memory_space<vmem>>, %arg3: memref<1x16x4xf32, #tpu.memory_space<vmem>>, %arg4: memref<4x4x8xf32, #tpu.memory_space<vmem>>, %arg5: memref<1x8xf32, #tpu.memory_space<vmem>>, %arg6: memref<1x16x8xf32, #tpu.memory_space<vmem>>) attributes {dimension_semantics = [#tpu.dimension_semantics<parallel>, #tpu.dimension_semantics<parallel>], iteration_bounds = array<i64: 2, 1>, scalar_prefetch = 0 : i64, scratch_operands = 0 : i64, tpu.core_type = #tpu.core_type<tc>, window_params = [{transform_indices = @transform_0, window_bounds = array<i64: 1, 8, 4>}, {transform_indices = @transform_1, window_bounds = array<i64: 1, 16, 4>}, {pipeline_mode = #tpu.pipeline_mode<synchronous>, transform_indices = @transform_2, window_bounds = array<i64: 4, 4, 8>}, {pipeline_mode = #tpu.pipeline_mode<synchronous>, transform_indices = @transform_3, window_bounds = array<i64: 1, 8>}, {transform_indices = @transform_4, window_bounds = array<i64: 1, 16, 8>}]} {
    %c0 = arith.constant 0 : index
    %c0_0 = arith.constant 0 : index
    %c0_1 = arith.constant 0 : index
    %0 = vector.load %arg2[%c0, %c0_0, %c0_1] : memref<1x8x4xf32, #tpu.memory_space<vmem>>, vector<1x8x4xf32>
    %1 = vector.shape_cast %0 : vector<1x8x4xf32> to vector<8x4xf32>
    %c0_i32 = arith.constant 0 : i32
    %2 = arith.cmpi sgt, %arg1, %c0_i32 : i32
    %cst = arith.constant 0.000000e+00 : f32
    %3 = vector.broadcast %cst : f32 to vector<8x4xf32>
    %4 = arith.select %2, %1, %3 : vector<8x4xf32>
    %c0_2 = arith.constant 0 : index
    %c0_3 = arith.constant 0 : index
    %c0_4 = arith.constant 0 : index
    %5 = vector.load %arg3[%c0_2, %c0_3, %c0_4] : memref<1x16x4xf32, #tpu.memory_space<vmem>>, vector<1x16x4xf32>
    %6 = vector.shape_cast %5 : vector<1x16x4xf32> to vector<16x4xf32>
    %7 = tpu.concatenate %4, %6 in 0 : vector<8x4xf32>, vector<16x4xf32> -> vector<24x4xf32>
    %cst_5 = arith.constant 0.000000e+00 : f32
    %8 = vector.broadcast %cst_5 : f32 to vector<16x8xf32>
    %9 = vector.extract_strided_slice %7 {offsets = [5, 0], sizes = [16, 4], strides = [1, 1]} : vector<24x4xf32> to vector<16x4xf32>
    %c0_6 = arith.constant 0 : index
    %c0_7 = arith.constant 0 : index
    %c0_8 = arith.constant 0 : index
    %10 = vector.load %arg4[%c0_6, %c0_7, %c0_8] : memref<4x4x8xf32, #tpu.memory_space<vmem>>, vector<1x4x8xf32>
    %11 = vector.shape_cast %10 : vector<1x4x8xf32> to vector<4x8xf32>
    %cst_9 = arith.constant dense<0.000000e+00> : vector<16x8xf32>
    %12 = tpu.matmul %9, %11, %cst_9 {dimension_numbers = #tpu.dot_dimension_numbers<[1], [0], [0], [1], [0, 0, 1, 1], [], []>} : vector<16x4xf32>, vector<4x8xf32>, vector<16x8xf32> -> vector<16x8xf32>
    %13 = arith.addf %8, %12 : vector<16x8xf32>
    %14 = vector.extract_strided_slice %7 {offsets = [6, 0], sizes = [16, 4], strides = [1, 1]} : vector<24x4xf32> to vector<16x4xf32>
    %c1 = arith.constant 1 : index
    %c0_10 = arith.constant 0 : index
    %c0_11 = arith.constant 0 : index
    %15 = vector.load %arg4[%c1, %c0_10, %c0_11] : memref<4x4x8xf32, #tpu.memory_space<vmem>>, vector<1x4x8xf32>
    %16 = vector.shape_cast %15 : vector<1x4x8xf32> to vector<4x8xf32>
    %cst_12 = arith.constant dense<0.000000e+00> : vector<16x8xf32>
    %17 = tpu.matmul %14, %16, %cst_12 {dimension_numbers = #tpu.dot_dimension_numbers<[1], [0], [0], [1], [0, 0, 1, 1], [], []>} : vector<16x4xf32>, vector<4x8xf32>, vector<16x8xf32> -> vector<16x8xf32>
    %18 = arith.addf %13, %17 : vector<16x8xf32>
    %19 = vector.extract_strided_slice %7 {offsets = [7, 0], sizes = [16, 4], strides = [1, 1]} : vector<24x4xf32> to vector<16x4xf32>
    %c2 = arith.constant 2 : index
    %c0_13 = arith.constant 0 : index
    %c0_14 = arith.constant 0 : index
    %20 = vector.load %arg4[%c2, %c0_13, %c0_14] : memref<4x4x8xf32, #tpu.memory_space<vmem>>, vector<1x4x8xf32>
    %21 = vector.shape_cast %20 : vector<1x4x8xf32> to vector<4x8xf32>
    %cst_15 = arith.constant dense<0.000000e+00> : vector<16x8xf32>
    %22 = tpu.matmul %19, %21, %cst_15 {dimension_numbers = #tpu.dot_dimension_numbers<[1], [0], [0], [1], [0, 0, 1, 1], [], []>} : vector<16x4xf32>, vector<4x8xf32>, vector<16x8xf32> -> vector<16x8xf32>
    %23 = arith.addf %18, %22 : vector<16x8xf32>
    %24 = vector.extract_strided_slice %7 {offsets = [8, 0], sizes = [16, 4], strides = [1, 1]} : vector<24x4xf32> to vector<16x4xf32>
    %c3 = arith.constant 3 : index
    %c0_16 = arith.constant 0 : index
    %c0_17 = arith.constant 0 : index
    %25 = vector.load %arg4[%c3, %c0_16, %c0_17] : memref<4x4x8xf32, #tpu.memory_space<vmem>>, vector<1x4x8xf32>
    %26 = vector.shape_cast %25 : vector<1x4x8xf32> to vector<4x8xf32>
    %cst_18 = arith.constant dense<0.000000e+00> : vector<16x8xf32>
    %27 = tpu.matmul %24, %26, %cst_18 {dimension_numbers = #tpu.dot_dimension_numbers<[1], [0], [0], [1], [0, 0, 1, 1], [], []>} : vector<16x4xf32>, vector<4x8xf32>, vector<16x8xf32> -> vector<16x8xf32>
    %28 = arith.addf %23, %27 : vector<16x8xf32>
    %c0_19 = arith.constant 0 : index
    %c0_20 = arith.constant 0 : index
    %29 = vector.load %arg5[%c0_19, %c0_20] : memref<1x8xf32, #tpu.memory_space<vmem>>, vector<1x8xf32>
    %30 = vector.broadcast %29 : vector<1x8xf32> to vector<16x8xf32>
    %31 = arith.addf %28, %30 : vector<16x8xf32>
    %c0_21 = arith.constant 0 : index
    %c0_22 = arith.constant 0 : index
    %c0_23 = arith.constant 0 : index
    %32 = vector.load %arg6[%c0_21, %c0_22, %c0_23] : memref<1x16x8xf32, #tpu.memory_space<vmem>>, vector<1x16x8xf32>
    %33 = vector.shape_cast %32 : vector<1x16x8xf32> to vector<16x8xf32>
    %34 = vector.shape_cast %31 : vector<16x8xf32> to vector<1x16x8xf32>
    tpu.vector_store %arg6[%c0_21, %c0_22, %c0_23], %34 {strides = array<i32>} : memref<1x16x8xf32, #tpu.memory_space<vmem>>, vector<1x16x8xf32>,
    return
  }
  func.func @transform_0(%arg0: i32, %arg1: i32) -> (i32, i32, i32) {
    %c2_i32 = arith.constant 2 : i32
    %0 = arith.muli %arg1, %c2_i32 : i32
    %c1_i32 = arith.constant 1 : i32
    %1 = arith.subi %0, %c1_i32 : i32
    %c0_i32 = arith.constant 0 : i32
    %2 = arith.maxsi %1, %c0_i32 : i32
    %c0_i32_0 = arith.constant 0 : i32
    %c0_i32_1 = arith.constant 0 : i32
    return %arg0, %2, %c0_i32_0 : i32, i32, i32
  }
  func.func @transform_1(%arg0: i32, %arg1: i32) -> (i32, i32, i32) {
    %c0_i32 = arith.constant 0 : i32
    %c0_i32_0 = arith.constant 0 : i32
    return %arg0, %arg1, %c0_i32 : i32, i32, i32
  }
  func.func @transform_2(%arg0: i32, %arg1: i32) -> (i32, i32, i32) {
    %c0_i32 = arith.constant 0 : i32
    %c0_i32_0 = arith.constant 0 : i32
    %c0_i32_1 = arith.constant 0 : i32
    %c0_i32_2 = arith.constant 0 : i32
    return %c0_i32, %c0_i32_0, %c0_i32_1 : i32, i32, i32
  }
  func.func @transform_3(%arg0: i32, %arg1: i32) -> (i32, i32) {
    %c0_i32 = arith.constant 0 : i32
    %c0_i32_0 = arith.constant 0 : i32
    %c0_i32_1 = arith.constant 0 : i32
    return %c0_i32, %c0_i32_0 : i32, i32
  }
  func.func @transform_4(%arg0: i32, %arg1: i32) -> (i32, i32, i32) {
    %c0_i32 = arith.constant 0 : i32
    %c0_i32_0 = arith.constant 0 : i32
    return %arg0, %arg1, %c0_i32 : i32, i32, i32
  }
}

</mosaic_0001>

<bundles_post_ra>
// kernel: tpu_custom_call.1
= control target key start
LH: loop header
LB: loop body
LE: loop exit
PB: predicated region body
PF: predicated region fallthrough
CT: control target
= control target key end

     0   :  { %s922_s15 = smov 0   ;;  %s924_s16 = smov 0   ;;  %s997_s0 = inlined_call_operand.vmem [shape: f32[2,16,4], index: 0, kind: input, shape index: {}]   ;;  %s998_s1 = inlined_call_operand.vmem [shape: f32[2,16,4], index: 1, kind: input, shape index: {}]   ;;  %s999_s2 = inlined_call_operand.vmem [shape: f32[4,4,8], index: 2, kind: input, shape index: {}]   ;;  %s1000_s3 = inlined_call_operand.vmem [shape: f32[1,8], index: 3, kind: input, shape index: {}]   ;;  %s1001_s4 = inlined_call_operand.vmem [shape: f32[2,16,8], index: 4, kind: output, shape index: {}]  }
   0x1   :  { %s926_s17 = smov 0  }
   0x2 LB: > { %s26_s0 = sadd.s32 1, %s890_s16  ;;  %p787_p0 = scmp.ge.s32.totalorder %s894_s17, 1  ;;  %s894_s17 = sphi %s926_s17, %s14_s17   ;;  %s890_s16 = sphi %s924_s16, %s1003_s16   ;;  %s886_s15 = sphi %s922_s15, %s1002_s15  }
   0x3   : > { %p28_p1 = scmp.ge.s32.totalorder %s26_s0, 2  ;;  %p214_p2 = scmp.lt.s32.totalorder %s894_s17, 3 }
   0x5   : > { %s1005_s0 = smov (%p28_p1, %s26_s0), 0  ;;  %p215_p3 = pnand %p787_p0, %p214_p2 }
   0x6   : > { %p277_p4 = scmp.lt.s32.totalorder (!%p215_p3), %s886_s15, 1 }
   0x7   : > { %218 = sbr.rel (%p215_p3) target bundleno = 226 (0xe2), region = 36 }
   0xc   : > { %v794_v0 = vld [vmem:[%s999_s2 + $0x4] sm:$0xf]  ;;  %vm321_vm0 = vcmask 1043456   ;;  %v304_v1 = vld [vmem:[%s999_s2] sm:$0xf]  ;;  %s1007_s15 = smov (!%p277_p4, %s886_s15), 1 }
   0xd   : > { %827 = vmatprep.subr.msk.mxu0 %vm321_vm0, %v794_v0  ;;  %832 = vmatprep.subr.msk.mxu1 %vm321_vm0, %v304_v1  ;;  %v801_v2 = vld [vmem:[%s999_s2 + $0x8] sm:$0xf]  ;;  %v805_v3 = vld [vmem:[%s999_s2 + $0xc] sm:$0xf]  ;;  %s813_s26 = sshll.u32 %s1007_s15, 4  ;;  %vm310_vm1 = vcmask 1041408  }
   0xe   : > { %828 = vmatpush3.msk.msra.mxu0 %vm321_vm0, %v794_v0  ;;  %833 = vmatpush3.msk.msra.mxu1 %vm321_vm0, %v304_v1  ;;  %s284_s29 = scalar_lea.vmem %s998_s1, %s813_s26  ;;  %v896_v4 = vmov 0.0   ;;  %vm316_vm2 = vcmask 31744   ;;  %vm400_vm3 = vcmask 1042432   ;;  %vm490_vm4 = vcmask 1040384   ;;  %v809_v31 = vld [vmem:[%s1000_s3] ss:$0 sm:$0xff]  ;;  %s294_s8 = scalar_lea.vmem %s1001_s4, %s813_s26 }
   0xf   : > { %837 = vmatprep.subr.msk.mxu0 %vm321_vm0, %v801_v2  ;;  %842 = vmatprep.subr.msk.mxu1 %vm321_vm0, %v805_v3  ;;  %v311_v5 = vrot.slane %v896_v4, 6  ;;  %v401_v6 = vrot.slane %v896_v4, 5  ;;  %v302_v7 = vld [vmem:[%s284_s29] sm:$0xff]  ;;  %v303_v8 = vld [vmem:[%s284_s29 + $0x8] sm:$0xff]  ;;  %v491_v9 = vrot.slane %v896_v4, 7  ;;  %vm675_vm5 = vcmask 64512  }
  0x10   : > { %v312_v10 = vrot.slane %v302_v7, 6  ;;  %v402_v11 = vrot.slane %v302_v7, 5  ;;  %v314_v12 = vrot.slane %v303_v8, 6  ;;  %v404_v13 = vrot.slane %v303_v8, 5 }
  0x11   : > { %v492_v14 = vrot.slane %v302_v7, 7  ;;  %v494_v15 = vrot.slane %v303_v8, 7 }
  0x12   : > { %v313_v16 = vsel %vm310_vm1, %v311_v5, %v312_v10  ;;  %v403_v17 = vsel %vm400_vm3, %v401_v6, %v402_v11  ;;  %v315_v18 = vsel %vm310_vm1, %v312_v10, %v314_v12  ;;  %v405_v19 = vsel %vm400_vm3, %v402_v11, %v404_v13 }
  0x13   : > { %829 = vmatprep.mubr.msk.f32.mxu0 %vm316_vm2, %v313_v16  ;;  %834 = vmatprep.mubr.msk.f32.mxu1 %vm316_vm2, %v403_v17  ;;  %v493_v20 = vsel %vm490_vm4, %v491_v9, %v492_v14  ;;  %v495_v21 = vsel %vm490_vm4, %v492_v14, %v494_v15 }
  0x14   : > { %830 = vmatmul.mubr.msk.f32.vlgmr.msra.gmra.mxu0 %vm316_vm2, %v315_v18  ;;  %835 = vmatmul.mubr.msk.f32.vlgmr.msra.gmra.mxu1 %vm316_vm2, %v405_v19 }
  0x15   : > { %838 = vmatpush3.msk.msra.mxu0 %vm321_vm0, %v801_v2  ;;  %843 = vmatpush3.msk.msra.mxu1 %vm321_vm0, %v805_v3 }
  0x16   : > { %839 = vmatprep.mubr.msk.f32.mxu0 %vm316_vm2, %v493_v20  ;;  %844 = vmatprep.mubr.msk.f32.mxu1 %vm316_vm2, %v302_v7 }
  0x18   : > { %840 = vmatmul.mubr.msk.f32.vlgmr.msra.gmra.mxu0 %vm316_vm2, %v495_v21  ;;  %845 = vmatmul.mubr.msk.f32.vlgmr.msra.gmra.mxu1 %vm316_vm2, %v303_v8 }
  0xd4   : > { %v831_v22 = vpop.f32.mrf.mxu0  ;;  %v836_v23 = vpop.f32.mrf.mxu1 }
  0xd5   : > { %v485_v26 = vadd.f32 %v836_v23, %v831_v22 }
  0xd6   : > { %v391_v24 = vpop.f32.mrf.mxu0  ;;  %v479_v25 = vpop.f32.mrf.mxu1 }
  0xd7   : > { %v480_v29 = vadd.f32 %v479_v25, %v391_v24 }
  0xd8   : > { %v841_v27 = vpop.f32.mrf.mxu0  ;;  %v846_v28 = vpop.f32.mrf.mxu1 }
  0xd9   : > { %v579_v30 = vadd.f32 %v841_v27, %v485_v26 }
  0xda   : > { %v569_v32 = vpop.f32.mrf.mxu0  ;;  %v655_v35 = vpop.f32.mrf.mxu1 }
  0xdb   : > { %v665_v33 = vadd.f32 %v846_v28, %v579_v30  ;;  %v578_v34 = vadd.f32 %v569_v32, %v480_v29 }
  0xdd   : > { %v674_v36 = vadd.f32 %v809_v31, %v665_v33  ;;  %v664_v37 = vadd.f32 %v655_v35, %v578_v34 }
  0xdf   : > { %677 = vst.msk [vmem:[%s294_s8 + $0x8] sm:$0xff] %vm675_vm5, %v674_v36  ;;  %v673_v38 = vadd.f32 %v809_v31, %v664_v37 }
  0xe1   : > { %676 = vst.msk [vmem:[%s294_s8] sm:$0xff] %vm675_vm5, %v673_v38 }
  0xe2 PF: > { %s14_s17 = sadd.s32 1, %s894_s17   ;;  %s1002_s15 = smov %s890_s16 }
  0xe3   : > { %p11_p5 = scmp.ge.s32.totalorder %s14_s17, 4   ;;  %s1003_s16 = smov %s1005_s0 }
  0xe5   :  { %13 = sbr.rel (!%p11_p5) target bundleno = 2 (0x2), region = 72 }

</bundles_post_ra>
